<compile_context>
chip_gen: v7x
topology: tpu7x:2x2x1
jax: 0.10.0
libtpu: 0.0.40
codegen_flags: <defaults>
</compile_context>

<pallas_src>
import functools

import jax
import jax.numpy as jnp
from jax.experimental import pallas as pl
from jax.experimental.pallas import tpu as pltpu

F_PAD = 128  # lane-dense feature width (multiple of 128)


def _pick_tile(n, pref=128):
    # Prefer MXU/lane-friendly 128 tiles; fall back to full extent otherwise.
    return pref if n % pref == 0 else n


def _pad2d(a, rows, cols):
    out = jnp.zeros((rows, cols), dtype=a.dtype)
    return out.at[: a.shape[0], : a.shape[1]].set(a)


# ---------------------------------------------------------------------------
# Kernel A:  E = s * (x @ W^T + b)   (W already transposed + lane padded)
# ---------------------------------------------------------------------------
def embed_kernel(x_ref, wt_ref, b_ref, s_ref, e_ref):
    emb = jnp.dot(x_ref[...], wt_ref[...], preferred_element_type=jnp.float32)
    emb = emb + b_ref[...]                       # (1, F_PAD) broadcasts
    e_ref[...] = (s_ref[...] * emb).astype(e_ref.dtype)


# ---------------------------------------------------------------------------
# Kernel B:  out = s * (A @ E + E), accumulated over k blocks of A's columns.
# ---------------------------------------------------------------------------
def aggregate_kernel(adj_ref, ek_ref, ei_ref, s_ref, o_ref, acc_ref, *, apply_relu):
    @pl.when(pl.program_id(1) == 0)
    def _():
        acc_ref[...] = jnp.zeros_like(acc_ref)

    # bf16 x bf16 MXU matmul with f32 accumulation.
    acc_ref[...] += jnp.dot(
        adj_ref[...], ek_ref[...], preferred_element_type=jnp.float32
    )

    @pl.when(pl.program_id(1) == pl.num_programs(1) - 1)
    def _():
        out = s_ref[...] * (acc_ref[...] + ei_ref[...].astype(jnp.float32))
        if apply_relu:
            out = jnp.maximum(out, 0.0)
        o_ref[...] = out.astype(o_ref.dtype)


def gcn_layer_fwd(adj_bf16, s, x, w_t_pad, b_pad, *, apply_relu):
    n, f_in = x.shape
    tm = _pick_tile(n)
    tk = _pick_tile(n)

    # --- pass 1: scaled embedding E = s * (x @ W^T + b), stored bf16 -------
    e = pl.pallas_call(
        embed_kernel,
        out_shape=jax.ShapeDtypeStruct((n, F_PAD), jnp.bfloat16),
        grid_spec=pltpu.PrefetchScalarGridSpec(
            num_scalar_prefetch=0,
            grid=(n // tm,),
            in_specs=[
                pl.BlockSpec((tm, f_in), lambda i: (i, 0)),
                pl.BlockSpec((f_in, F_PAD), lambda i: (0, 0)),
                pl.BlockSpec((1, F_PAD), lambda i: (0, 0)),
                pl.BlockSpec((tm, 1), lambda i: (i, 0)),
            ],
            out_specs=pl.BlockSpec((tm, F_PAD), lambda i: (i, 0)),
        ),
        compiler_params=pltpu.CompilerParams(dimension_semantics=("parallel",)),
    )(x, w_t_pad, b_pad, s)

    # --- pass 2: tiled aggregation  out = s * (A @ E + E) -------------------
    out = pl.pallas_call(
        functools.partial(aggregate_kernel, apply_relu=apply_relu),
        out_shape=jax.ShapeDtypeStruct((n, F_PAD), jnp.float32),
        grid_spec=pltpu.PrefetchScalarGridSpec(
            num_scalar_prefetch=0,
            grid=(n // tm, n // tk),
            in_specs=[
                pl.BlockSpec((tm, tk), lambda i, k: (i, k)),        # adj block
                pl.BlockSpec((tk, F_PAD), lambda i, k: (k, 0)),     # E rows (matmul)
                pl.BlockSpec((tm, F_PAD), lambda i, k: (i, 0)),     # E rows (self loop)
                pl.BlockSpec((tm, 1), lambda i, k: (i, 0)),         # d^{-1/2}
            ],
            out_specs=pl.BlockSpec((tm, F_PAD), lambda i, k: (i, 0)),
            scratch_shapes=[pltpu.VMEM((tm, F_PAD), jnp.float32)],
        ),
        compiler_params=pltpu.CompilerParams(
            dimension_semantics=("parallel", "arbitrary")
        ),
    )(adj_bf16, e, e, s)
    return out


def gcn_forward(adj, x, w1, b1, w2, b2, out_features):
    n = adj.shape[0]
    f_in = x.shape[1]

    # Degrees of (A + I); s = d^{-1/2} folds the symmetric normalization.
    deg = jnp.sum(adj, axis=1) + 1.0
    s = (1.0 / jnp.sqrt(deg)).reshape(n, 1).astype(jnp.float32)
    adj_bf16 = adj.astype(jnp.bfloat16)          # 0/1 entries: exact in bf16

    # Pre-transposed, lane-padded (to 128) nn.Linear parameters.
    w1t = _pad2d(w1.T.astype(jnp.float32), f_in, F_PAD)            # (f_in, 128)
    b1p = _pad2d(b1.reshape(1, -1).astype(jnp.float32), 1, F_PAD)
    w2t = _pad2d(w2.T.astype(jnp.float32), F_PAD, F_PAD)           # (128, 128)
    b2p = _pad2d(b2.reshape(1, -1).astype(jnp.float32), 1, F_PAD)

    h = gcn_layer_fwd(adj_bf16, s, x.astype(jnp.float32), w1t, b1p,
                      apply_relu=True)
    # TODO(synk): nn.Dropout(p=0.5) is identity in eval mode; training-mode
    # dropout would use pltpu.prng_seed / pltpu.prng_random_bits in-kernel.
    out = gcn_layer_fwd(adj_bf16, s, h, w2t, b2p, apply_relu=False)
    return out[:, :out_features]


if __name__ == "__main__":
    key = jax.random.PRNGKey(0)
    k_adj, k_x, k_w1, k_b1, k_w2, k_b2 = jax.random.split(key, 6)

    N, F_IN, HIDDEN, F_OUT = 256, 32, 16, 8

    # Deterministic synthetic symmetric 0/1 adjacency (no self loops; the
    # normalization adds the identity, like the reference module).
    raw = (jax.random.uniform(k_adj, (N, N)) < 0.05).astype(jnp.float32)
    adj = jnp.maximum(raw, raw.T)
    adj = adj * (1.0 - jnp.eye(N, dtype=jnp.float32))

    x = jax.random.normal(k_x, (N, F_IN), dtype=jnp.float32)

    bnd1 = 1.0 / jnp.sqrt(F_IN)
    w1 = jax.random.uniform(k_w1, (HIDDEN, F_IN), minval=-bnd1, maxval=bnd1)
    b1 = jax.random.uniform(k_b1, (HIDDEN,), minval=-bnd1, maxval=bnd1)
    bnd2 = 1.0 / jnp.sqrt(HIDDEN)
    w2 = jax.random.uniform(k_w2, (F_OUT, HIDDEN), minval=-bnd2, maxval=bnd2)
    b2 = jax.random.uniform(k_b2, (F_OUT,), minval=-bnd2, maxval=bnd2)

    out = gcn_forward(adj, x, w1, b1, w2, b2, F_OUT)
    out = jax.block_until_ready(out)

    # Pure f32 JAX reference (dropout = identity in eval mode).
    a = adj + jnp.eye(N, dtype=jnp.float32)
    dinv = 1.0 / jnp.sqrt(jnp.sum(a, axis=1))
    norm_adj = a * dinv[:, None] * dinv[None, :]
    h_ref = jnp.maximum(norm_adj @ (x @ w1.T + b1), 0.0)
    ref = norm_adj @ (h_ref @ w2.T + b2)

    assert out.shape == (N, F_OUT)
    err = float(jnp.max(jnp.abs(out - ref)))
    assert jnp.allclose(out, ref, atol=2e-2, rtol=2e-2), f"max abs err {err}"

    print("KERNEL_OK")
</pallas_src>

<mosaic_0001>
module attributes {stable_mosaic.version = 11 : i64} {
  func.func @embed_kernel(%arg0: i32, %arg1: memref<128x32xf32, #tpu.memory_space<vmem>>, %arg2: memref<32x128xf32, #tpu.memory_space<vmem>>, %arg3: memref<1x128xf32, #tpu.memory_space<vmem>>, %arg4: memref<128x1xf32, #tpu.memory_space<vmem>>, %arg5: memref<128x128xbf16, #tpu.memory_space<vmem>>) attributes {dimension_semantics = [#tpu.dimension_semantics<parallel>], iteration_bounds = array<i64: 2>, scalar_prefetch = 0 : i64, scratch_operands = 0 : i64, tpu.core_type = #tpu.core_type<tc>, window_params = [{transform_indices = @transform_0, window_bounds = array<i64: 128, 32>}, {pipeline_mode = #tpu.pipeline_mode<synchronous>, transform_indices = @transform_1, window_bounds = array<i64: 32, 128>}, {pipeline_mode = #tpu.pipeline_mode<synchronous>, transform_indices = @transform_2, window_bounds = array<i64: 1, 128>}, {transform_indices = @transform_3, window_bounds = array<i64: 128, 1>}, {transform_indices = @transform_4, window_bounds = array<i64: 128, 128>}]} {
    %c0 = arith.constant 0 : index
    %c0_0 = arith.constant 0 : index
    %0 = vector.load %arg1[%c0, %c0_0] : memref<128x32xf32, #tpu.memory_space<vmem>>, vector<128x32xf32>
    %c0_1 = arith.constant 0 : index
    %c0_2 = arith.constant 0 : index
    %1 = vector.load %arg2[%c0_1, %c0_2] : memref<32x128xf32, #tpu.memory_space<vmem>>, vector<32x128xf32>
    %cst = arith.constant dense<0.000000e+00> : vector<128x128xf32>
    %2 = tpu.matmul %0, %1, %cst {dimension_numbers = #tpu.dot_dimension_numbers<[1], [0], [0], [1], [0, 0, 1, 1], [], []>} : vector<128x32xf32>, vector<32x128xf32>, vector<128x128xf32> -> vector<128x128xf32>
    %c0_3 = arith.constant 0 : index
    %c0_4 = arith.constant 0 : index
    %3 = vector.load %arg3[%c0_3, %c0_4] : memref<1x128xf32, #tpu.memory_space<vmem>>, vector<1x128xf32>
    %4 = vector.broadcast %3 : vector<1x128xf32> to vector<128x128xf32>
    %5 = arith.addf %2, %4 : vector<128x128xf32>
    %c0_5 = arith.constant 0 : index
    %c0_6 = arith.constant 0 : index
    %6 = vector.load %arg4[%c0_5, %c0_6] : memref<128x1xf32, #tpu.memory_space<vmem>>, vector<128x1xf32>
    %7 = vector.broadcast %6 : vector<128x1xf32> to vector<128x128xf32>
    %8 = arith.mulf %7, %5 : vector<128x128xf32>
    %9 = arith.truncf %8 : vector<128x128xf32> to vector<128x128xbf16>
    %c0_7 = arith.constant 0 : index
    %c0_8 = arith.constant 0 : index
    %10 = vector.load %arg5[%c0_7, %c0_8] : memref<128x128xbf16, #tpu.memory_space<vmem>>, vector<128x128xbf16>
    tpu.vector_store %arg5[%c0_7, %c0_8], %9 {strides = array<i32>} : memref<128x128xbf16, #tpu.memory_space<vmem>>, vector<128x128xbf16>,
    return
  }
  func.func @transform_0(%arg0: i32) -> (i32, i32) {
    %c0_i32 = arith.constant 0 : i32
    %c0_i32_0 = arith.constant 0 : i32
    return %arg0, %c0_i32 : i32, i32
  }
  func.func @transform_1(%arg0: i32) -> (i32, i32) {
    %c0_i32 = arith.constant 0 : i32
    %c0_i32_0 = arith.constant 0 : i32
    %c0_i32_1 = arith.constant 0 : i32
    return %c0_i32, %c0_i32_0 : i32, i32
  }
  func.func @transform_2(%arg0: i32) -> (i32, i32) {
    %c0_i32 = arith.constant 0 : i32
    %c0_i32_0 = arith.constant 0 : i32
    %c0_i32_1 = arith.constant 0 : i32
    return %c0_i32, %c0_i32_0 : i32, i32
  }
  func.func @transform_3(%arg0: i32) -> (i32, i32) {
    %c0_i32 = arith.constant 0 : i32
    %c0_i32_0 = arith.constant 0 : i32
    return %arg0, %c0_i32 : i32, i32
  }
  func.func @transform_4(%arg0: i32) -> (i32, i32) {
    %c0_i32 = arith.constant 0 : i32
    %c0_i32_0 = arith.constant 0 : i32
    return %arg0, %c0_i32 : i32, i32
  }
}

</mosaic_0001>

<bundles_post_ra>
// kernel: tpu_custom_call.1
= control target key start
LH: loop header
LB: loop body
LE: loop exit
PB: predicated region body
PF: predicated region fallthrough
CT: control target
= control target key end

     0   :  { %9 = vsyncpa [#allocation3], 0  ;;  %s1227_s0 = inlined_call_operand.vmem [shape: f32[256,32], index: 0, kind: input, shape index: {}]   ;;  %s1228_s1 = inlined_call_operand.vmem [shape: f32[32,128], index: 1, kind: input, shape index: {}]   ;;  %s1229_s2 = inlined_call_operand.vmem [shape: f32[1,128], index: 2, kind: input, shape index: {}]   ;;  %s1230_s3 = inlined_call_operand.vmem [shape: f32[256,1], index: 3, kind: input, shape index: {}]   ;;  %s1231_s4 = inlined_call_operand.hbm [shape: bf16[256,128], index: 4, kind: output, shape index: {}]  }
   0x1   :  { %11 = vsyncpa [#allocation3 + $0x1], 0  ;;  %s1034_s15 = smov 0   ;;  %s1036_s16 = smov 0  }
   0x2   :  { %s1038_s17 = smov 0   ;;  %s1040_s18 = smov 0  }
   0x3 LB: > { %s1055_s19 = sadd.s32 4294967295, %s1003_s18   ;;  %s722_s20 = sadd.s32 4294967294, %s1003_s18   ;;  %s1003_s18 = sphi %s1040_s18, %s1237_s18   ;;  %s999_s17 = sphi %s1038_s17, %s1236_s17   ;;  %s995_s16 = sphi %s1036_s16, %s1235_s16   ;;  %s991_s15 = sphi %s1034_s15, %s1234_s15  }
   0x4   : > { %s1059_s21 = sadd.s32 1, %s1003_s18   ;;  %s118_s22 = sadd.s32 1, %s999_s17 }
   0x5   : > { %s115_s23 = ssub.s32 %s1003_s18, %s1059_s21  ;;  %p128_p0 = scmp.ne.s32.totalorder %s999_s17, %s995_s16 }
   0x6   : > { %p116_p1 = scmp.eq.s32.totalorder %s115_s23, 0  ;;  %p129_p2 = scmp.eq.s32.totalorder %s1055_s19, 1 }
   0x7   : > { %p134_p3 = scmp.ne.s32.totalorder %s995_s16, %s991_s15  ;;  %p135_p4 = scmp.eq.s32.totalorder %s722_s20, 1 }
   0x8   : > { %s1070_s24 = scalar_select %p116_p1, %s999_s17, %s118_s22  }
   0x9   : > { %p1072_p5 = por %p129_p2, %p128_p0  ;;  %p1076_p6 = por %p135_p4, %p134_p3 }
   0xa   : > { %p725_p7 = scmp.ge.s32.totalorder %s1003_s18, 1  ;;  %p177_p8 = scmp.lt.s32.totalorder %s1003_s18, 3 }
   0xc   : > { %p178_p9 = pnand %p725_p7, %p177_p8 }
   0xd   : > { %v237_v0 = vld [vmem:[%s1228_s1] sm:$0xff] (!%p178_p9)  ;;  %v238_v1 = vld [vmem:[%s1228_s1 + $0x8] sm:$0xff] (!%p178_p9)  ;;  %v239_v2 = vld [vmem:[%s1228_s1 + $0x10] sm:$0xff] (!%p178_p9)  ;;  %s727_s7 = sshll.u32 (!%p178_p9), %s1055_s19, 4  ;;  %v1005_v5 = vmov (!%p178_p9), 0   ;;  %vm248_vm0 = vcmask (!%p178_p9), 261120  }
   0xe   : > { %181 = sbr.rel (%p178_p9) target bundleno = 273 (0x111), region = 36  ;;  %v885_v3 = vpack.c.bf16 (!%p178_p9), %v238_v1, %v237_v0  ;;  %v240_v4 = vld [vmem:[%s1228_s1 + $0x18] sm:$0xff] (!%p178_p9)  ;;  %p209_p10 = scmp.lt.s32.totalorder (!%p178_p9), %s727_s7, 31  ;;  %940 = vset.pattern.permute.xlu1 (!%p178_p9), %v1005_v5  ;;  %939 = vset.pattern.permute.xlu0 (!%p178_p9), %v1005_v5  ;;  %v731_v49 = vld [vmem:[%s1229_s2] ss:$0 sm:$0xff] (!%p178_p9) }
   0xf   : > { %v889_v6 = vpack.c.bf16 (!%p178_p9), %v240_v4, %v239_v2  ;;  %s205_s28 = sand.u32 (!%p178_p9), 1, %s995_s16   ;;  %s785_s5 = sshll.u32 (!%p178_p9), %s1055_s19, 10 }
  0x10   : > { %886 = vmatprep.subr.bf16.mxu0 (!%p178_p9), %v885_v3  ;;  %893 = vmatprep.subr.bf16.mxu1 (!%p178_p9), %v885_v3  ;;  %s726_s29 = sshll.u32 (!%p178_p9), %s205_s28, 6  ;;  %s1178_s9 = scalar_lea.hbm (!%p178_p9), %s1231_s4, %s785_s5 }
  0x11   : > { %888 = vmatpush3.bf16.msra.mxu0 (!%p178_p9), %v885_v3  ;;  %895 = vmatpush3.bf16.msra.mxu1 (!%p178_p9), %v885_v3  ;;  %s1163_s30 = scalar_lea.vmem (!%p178_p9), [#allocation2], %s726_s29  ;;  %s1186_s19 = scalar_lea.sflag (!%p178_p9), [#allocation3], %s205_s28 }
  0x12   : > { %890 = vmatprep.subr.bf16.mxu0 (!%p178_p9), %v889_v6  ;;  %894 = vmatprep.subr.bf16.mxu1 (!%p178_p9), %v889_v6  ;;  %s648_s6 = sshll.u32 (!%p178_p9), %s1163_s30, 4  ;;  %s1006_s11 = smov (!%p178_p9), [#allocation2]   ;;  %s1180_s6 = int_to_ptr.vmem [resolvable:$true] %s648_s6 }
  0x13   : > { %s945_s12 = sshll.u32 (!%p178_p9), %s1006_s11, 4  ;;  %s946_s12 = int_to_ptr.vmem [resolvable:$false] %s945_s12 }
  0x14   : > { %p948_p0 = scmp.lt.s32.totalorder (!%p178_p9), %s1180_s6, %s946_s12 }
  0x15   : > { %s1239_s7 = smov (!%p209_p10, %s727_s7), 31  ;;  %892 = vmatpush3.bf16.msra.mxu0 %v889_v6  ;;  %896 = vmatpush3.bf16.msra.mxu1 %v889_v6 }
  0x16   : > { %s728_s10 = sshll.u32 %s1239_s7, 3 }
  0x17   : > { %s1098_s13 = scalar_lea.vmem %s1227_s0, %s728_s10  ;;  %s1111_s22 = scalar_lea.vmem %s1230_s3, %s728_s10 }
  0x18   : > { %v221_v7 = vld [vmem:[%s1098_s13] sm:$0xff]  ;;  %v222_v9 = vld [vmem:[%s1098_s13 + $0x8] sm:$0xff]  ;;  %v223_v11 = vld [vmem:[%s1098_s13 + $0x10] sm:$0xff]  ;;  %s941_s10 = scalar_lea.vmem %s1180_s6, 1024 }
  0x19   : > { %v229_v8 = vld [vmem:[%s1098_s13 + $0x40] sm:$0xff]  ;;  %v230_v10 = vld [vmem:[%s1098_s13 + $0x48] sm:$0xff]  ;;  %861 = vmatprep.mubr.msk.f32.mxu0 %vm248_vm0, %v221_v7  ;;  %v231_v12 = vld [vmem:[%s1098_s13 + $0x50] sm:$0xff]  ;;  %p942_p11 = scmp.ne.s32.totalorder %s1180_s6, %s941_s10 }
  0x1a   : > { %873 = vmatprep.mubr.msk.f32.mxu1 %vm248_vm0, %v229_v8  ;;  %862 = vmatmul.mubr.msk.f32.vlgmr.msra.gmra.mrb[0].mxu0 %vm248_vm0, %v222_v9  ;;  %v224_v13 = vld [vmem:[%s1098_s13 + $0x18] sm:$0xff]  ;;  %v444_v15 = vld [vmem:[%s1111_s22 + $0x10] sm:$0xff]  ;;  %v442_v16 = vld [vmem:[%s1111_s22] sm:$0xff] }
  0x1b   : > { %874 = vmatmul.mubr.msk.f32.vlgmr.msra.gmra.mrb[0].mxu1 %vm248_vm0, %v230_v10  ;;  %864 = vmatprep.mubr.msk.f32.mxu0 %vm248_vm0, %v223_v11  ;;  %v232_v14 = vld [vmem:[%s1098_s13 + $0x58] sm:$0xff]  ;;  %v225_v17 = vld [vmem:[%s1098_s13 + $0x20] sm:$0xff]  ;;  %v443_v20 = vld [vmem:[%s1111_s22 + $0x8] sm:$0xff]  ;;  %p943_p12 = pnand %p942_p11, %p1072_p5 }
  0x1c   : > { %876 = vmatprep.mubr.msk.f32.mxu1 %vm248_vm0, %v231_v12  ;;  %v233_v18 = vld [vmem:[%s1098_s13 + $0x60] sm:$0xff]  ;;  %470 = vperm.xlu1 %940, %v444_v15   ;;  %v445_v19 = vld [vmem:[%s1111_s22 + $0x18] sm:$0xff]  ;;  %v226_v21 = vld [vmem:[%s1098_s13 + $0x28] sm:$0xff] }
  0x1d   : > { %460 = vperm.xlu0 %939, %v442_v16   ;;  %v234_v22 = vld [vmem:[%s1098_s13 + $0x68] sm:$0xff]  ;;  %v227_v23 = vld [vmem:[%s1098_s13 + $0x30] sm:$0xff]  ;;  %v446_v26 = vld [vmem:[%s1111_s22 + $0x20] sm:$0xff]  ;;  %p944_p13 = pneg %p943_p12 }
  0x1e   : > { %865 = vmatmul.mubr.msk.f32.gmra.mrb[2].mxu0 %vm248_vm0, %v224_v13  ;;  %v235_v24 = vld [vmem:[%s1098_s13 + $0x70] sm:$0xff]  ;;  %v447_v25 = vld [vmem:[%s1111_s22 + $0x28] sm:$0xff]  ;;  %v228_v27 = vld [vmem:[%s1098_s13 + $0x38] sm:$0xff] }
  0x1f   : > { %877 = vmatmul.mubr.msk.f32.gmra.mrb[2].mxu1 %vm248_vm0, %v232_v14  ;;  %867 = vmatprep.mubr.msk.f32.mxu0 %vm248_vm0, %v225_v17  ;;  %v236_v28 = vld [vmem:[%s1098_s13 + $0x78] sm:$0xff]  ;;  %v448_v30 = vld [vmem:[%s1111_s22 + $0x30] sm:$0xff]  ;;  %v451_v31 = vld [vmem:[%s1111_s22 + $0x48] sm:$0xff]  ;;  %s947_s13 = scalar_lea.vmem %s946_s12, 2048 }
  0x20   : > { %879 = vmatprep.mubr.msk.f32.mxu1 %vm248_vm0, %v233_v18  ;;  %475 = vperm.xlu1 %940, %v445_v19   ;;  %v449_v29 = vld [vmem:[%s1111_s22 + $0x38] sm:$0xff]  ;;  %v450_v32 = vld [vmem:[%s1111_s22 + $0x40] sm:$0xff]  ;;  %v452_v34 = vld [vmem:[%s1111_s22 + $0x50] sm:$0xff]  ;;  %p949_p1 = scmp.lt.s32.totalorder %s947_s13, %s941_s10 }
  0x21   : > { %465 = vperm.xlu0 %939, %v443_v20   ;;  %v453_v33 = vld [vmem:[%s1111_s22 + $0x58] sm:$0xff]  ;;  %v455_v35 = vld [vmem:[%s1111_s22 + $0x68] sm:$0xff]  ;;  %v454_v36 = vld [vmem:[%s1111_s22 + $0x60] sm:$0xff] }
  0x22   : > { %868 = vmatmul.mubr.msk.f32.gmra.mrb[4].mxu0 %vm248_vm0, %v226_v21  ;;  %v457_v37 = vld [vmem:[%s1111_s22 + $0x78] sm:$0xff]  ;;  %v456_v38 = vld [vmem:[%s1111_s22 + $0x70] sm:$0xff]  ;;  %p950_p2 = por %p949_p1, %p948_p0 }
  0x23   : > { %880 = vmatmul.mubr.msk.f32.gmra.mrb[4].mxu1 %vm248_vm0, %v234_v22  ;;  %870 = vmatprep.mubr.msk.f32.mxu0 %vm248_vm0, %v227_v23 }
  0x24   : > { %882 = vmatprep.mubr.msk.f32.mxu1 %vm248_vm0, %v235_v24  ;;  %485 = vperm.xlu1 %940, %v447_v25   ;;  %p951_p3 = pnand %p950_p2, %p944_p13 }
  0x25   : > { %480 = vperm.xlu0 %939, %v446_v26  }
  0x26   : > { %871 = vmatmul.mubr.msk.f32.gmra.mrb[6].mxu0 %vm248_vm0, %v228_v27 }
  0x27   : > { %883 = vmatmul.mubr.msk.f32.gmra.mrb[6].mxu1 %vm248_vm0, %v236_v28 }
  0x28   : > { %495 = vperm.xlu1 %940, %v449_v29  }
  0x29   : > { %490 = vperm.xlu0 %939, %v448_v30  }
  0x2c   : > { %505 = vperm.xlu1 %940, %v451_v31  }
  0x2d   : > { %500 = vperm.xlu0 %939, %v450_v32  }
  0x30   : > { %515 = vperm.xlu1 %940, %v453_v33  }
  0x31   : > { %510 = vperm.xlu0 %939, %v452_v34  }
  0x34   : > { %525 = vperm.xlu1 %940, %v455_v35  }
  0x35   : > { %520 = vperm.xlu0 %939, %v454_v36  }
  0x38   : > { %535 = vperm.xlu1 %940, %v457_v37  }
  0x39   : > { %530 = vperm.xlu0 %939, %v456_v38  }
  0x9b   : > { %v471_v39 = vpop.permute.xlu1 %470 }
  0x9c   : > { %v461_v40 = vpop.permute.xlu0 %460 }
  0x9f   : > { %v476_v41 = vpop.permute.xlu1 %475 }
  0xa0   : > { %v466_v42 = vpop.permute.xlu0 %465 }
  0xa3   : > { %v486_v43 = vpop.permute.xlu1 %485 }
  0xa4   : > { %v481_v44 = vpop.permute.xlu0 %480 }
  0xa7   : > { %v1153_v45 = vpop.permute.xlu1 %495 }
  0xa8   : > { %v1155_v46 = vpop.permute.xlu0 %490 }
  0xab   : > { %v506_v47 = vpop.permute.xlu1 %505 }
  0xac   : > { %v501_v48 = vpop.permute.xlu0 %500 }
  0xaf   : > { %v516_v50 = vpop.permute.xlu1 %515 }
  0xb0   : > { %v511_v51 = vpop.permute.xlu0 %510 }
  0xb3   : > { %v526_v10 = vpop.permute.xlu1 %525 }
  0xb4   : > { %v521_v11 = vpop.permute.xlu0 %520 }
  0xb7   : > { %v536_v36 = vpop.permute.xlu1 %535 }
  0xed   : > { %v863_v52 = vpop.f32.mrb[0].mxu0 }
  0xee   : > { %v875_v53 = vpop.f32.mrb[0].mxu1  ;;  %v369_v54 = vadd.f32 %v863_v52, %v731_v49  ;;  %v363_v56 = vpop.f32.mrb[1].mxu0 }
  0xef   : > { %v409_v55 = vadd.f32 %v875_v53, %v731_v49  ;;  %v403_v57 = vpop.f32.mrb[1].mxu1  ;;  %v364_v58 = vadd.f32 %v731_v49, %v363_v56 }
  0xf0   : > { %v404_v59 = vadd.f32 %v731_v49, %v403_v57  ;;  %v539_v60 = vmul.f32 %v466_v42, %v369_v54 }
  0xf1   : > { %v547_v61 = vmul.f32 %v506_v47, %v409_v55  ;;  %v538_v62 = vmul.f32 %v461_v40, %v364_v58  ;;  %v866_v0 = vpop.f32.mrb[2].mxu0 }
  0xf2   : > { %v546_v63 = vmul.f32 %v501_v48, %v404_v59  ;;  %v878_v1 = vpop.f32.mrb[2].mxu1  ;;  %v379_v2 = vadd.f32 %v866_v0, %v731_v49  ;;  %v373_v4 = vpop.f32.mrb[3].mxu0 }
  0xf3   : > { %v419_v3 = vadd.f32 %v878_v1, %v731_v49  ;;  %v413_v5 = vpop.f32.mrb[3].mxu1  ;;  %v789_v6 = vpack.c.bf16 %v539_v60, %v538_v62  ;;  %v374_v8 = vadd.f32 %v731_v49, %v373_v4 }
  0xf4   : > { %v809_v7 = vpack.c.bf16 %v547_v61, %v546_v63  ;;  %v414_v9 = vadd.f32 %v731_v49, %v413_v5  ;;  %v541_v12 = vmul.f32 %v476_v41, %v379_v2  ;;  %v531_v41 = vpop.permute.xlu0 %530 }
  0xf5   : > { %v549_v13 = vmul.f32 %v516_v50, %v419_v3  ;;  %790 = vst [vmem:[%s1163_s30] sm:$0xff] %v789_v6   ;;  %v540_v14 = vmul.f32 %v471_v39, %v374_v8  ;;  %v869_v16 = vpop.f32.mrb[4].mxu0 }
  0xf6   : > { %829 = vst [vmem:[%s1163_s30 + $0x20] sm:$0xff] %v809_v7   ;;  %v548_v15 = vmul.f32 %v511_v51, %v414_v9  ;;  %v881_v17 = vpop.f32.mrb[4].mxu1  ;;  %v389_v18 = vadd.f32 %v869_v16, %v731_v49  ;;  %v383_v20 = vpop.f32.mrb[5].mxu0 }
  0xf7   : > { %v429_v19 = vadd.f32 %v881_v17, %v731_v49  ;;  %v423_v21 = vpop.f32.mrb[5].mxu1  ;;  %v794_v22 = vpack.c.bf16 %v541_v12, %v540_v14  ;;  %v384_v24 = vadd.f32 %v731_v49, %v383_v20 }
  0xf8   : > { %v814_v23 = vpack.c.bf16 %v549_v13, %v548_v15  ;;  %v424_v25 = vadd.f32 %v731_v49, %v423_v21  ;;  %v543_v26 = vmul.f32 %v486_v43, %v389_v18 }
  0xf9   : > { %v551_v27 = vmul.f32 %v526_v10, %v429_v19  ;;  %826 = vst [vmem:[%s1163_s30 + $0x8] sm:$0xff] %v794_v22   ;;  %v542_v28 = vmul.f32 %v481_v44, %v384_v24  ;;  %v872_v30 = vpop.f32.mrb[6].mxu0 }
  0xfa   : > { %830 = vst [vmem:[%s1163_s30 + $0x28] sm:$0xff] %v814_v23   ;;  %v550_v29 = vmul.f32 %v521_v11, %v424_v25  ;;  %v884_v31 = vpop.f32.mrb[6].mxu1  ;;  %v399_v32 = vadd.f32 %v872_v30, %v731_v49  ;;  %v393_v34 = vpop.f32.mrb[7].mxu0 }
  0xfb   : > { %v439_v33 = vadd.f32 %v884_v31, %v731_v49  ;;  %v433_v35 = vpop.f32.mrb[7].mxu1  ;;  %v799_v37 = vpack.c.bf16 %v543_v26, %v542_v28  ;;  %v394_v39 = vadd.f32 %v731_v49, %v393_v34 }
  0xfc   : > { %v819_v38 = vpack.c.bf16 %v551_v27, %v550_v29  ;;  %v434_v40 = vadd.f32 %v731_v49, %v433_v35  ;;  %v545_v42 = vmul.f32 %v1153_v45, %v399_v32 }
  0xfd   : > { %v553_v43 = vmul.f32 %v536_v36, %v439_v33  ;;  %827 = vst [vmem:[%s1163_s30 + $0x10] sm:$0xff] %v799_v37   ;;  %v544_v44 = vmul.f32 %v1155_v46, %v394_v39 }
  0xfe   : > { %831 = vst [vmem:[%s1163_s30 + $0x30] sm:$0xff] %v819_v38   ;;  %v552_v47 = vmul.f32 %v531_v41, %v434_v40 }
  0xff   : > { %v804_v48 = vpack.c.bf16 %v545_v42, %v544_v44 }
 0x100   : > { %v824_v49 = vpack.c.bf16 %v553_v43, %v552_v47 }
 0x101   : > { %828 = vst [vmem:[%s1163_s30 + $0x18] sm:$0xff] %v804_v48  }
 0x102   : > { %832 = vst [vmem:[%s1163_s30 + $0x38] sm:$0xff] %v824_v49  }
 0x103   : > { %954 = shalt.err (!%p951_p3)
}
 0x104   : > { %s955_s14 = scalar_lea.hbm %s1178_s9, 1024  ;;  %s959_s23 = scalar_lea.hbm %s1231_s4, 2048 }
 0x105   : > { %p956_p4 = scmp.ne.s32.totalorder %s1178_s9, %s955_s14  ;;  %p960_p9 = scmp.lt.u32.totalorder %s1178_s9, %s1231_s4 }
 0x106   : > { %p961_p10 = scmp.lt.u32.totalorder %s959_s23, %s955_s14  ;;  %p963_p12 = scmp.lt.u32.totalorder %s955_s14, %s1178_s9 }
 0x107   : > { %p957_p7 = pnand %p956_p4, %p1072_p5 }
 0x108   : > { %p962_p11 = por %p961_p10, %p960_p9 }
 0x109   : > { %p958_p8 = pneg %p957_p7 }
 0x10a   : > { %p964_p13 = por %p963_p12, %p962_p11 }
 0x10c   : > { %p965_p0 = pnand %p964_p13, %p958_p8 }
 0x10e   : > { %968 = shalt.err (!%p965_p0)
}
 0x10f   : > { %s1007_s29 = smov 64   ;;  %s1008_s30 = smov 4  }
 0x110   : > { %897 = dma.vmem_to_hbm [thread:$0]  (%p1072_p5), %s1180_s6, 1024, %s1178_s9, %s1186_s19, %s1007_s29, %s1007_s29, %s1008_s30  }
 0x111 PF: > { %p903_p1 = scmp.ge.s32.totalorder %s1003_s18, 2  ;;  %s663_s5 = sand.u32 1, %s991_s15  }
 0x112   : > { %s664_s7 = scalar_lea.sflag [#allocation3], %s663_s5 }
 0x113   : > { %p900_p2 = pnand %p903_p1, %p1076_p6 }
 0x115   : > { %986 = dma.done.wait (!%p900_p2), %s664_s7, 1024  }
 0x116   : > { %988 = vsyncadd (!%p900_p2), %s664_s7, 4294966272  ;;  %p14_p3 = scmp.ge.s32.totalorder %s1059_s21, 4   ;;  %s1234_s15 = smov %s995_s16 }
 0x117   : > { %s1235_s16 = smov %s999_s17  ;;  %s1236_s17 = smov %s1070_s24 }
 0x118   : > { %s1237_s18 = smov %s1059_s21  ;;  %16 = sbr.rel (!%p14_p3) target bundleno = 3 (0x3), region = 74 }
 0x11f   :  { %669 = vsyncpa [#allocation3], 1 }
 0x120   :  { %671 = vsyncpa [#allocation3 + $0x1], 1 }

</bundles_post_ra>
